<compile_context>
chip_gen: v5e
topology: v5e:2x2
jax: 0.10.0
libtpu: 0.0.40
codegen_flags: <defaults>
</compile_context>

<pallas_src>
import math

import jax
import jax.numpy as jnp
from jax.experimental import pallas as pl
from jax.experimental.pallas import tpu as pltpu

_LANE = 128
_SUBLANE = 8
_MAX_BATCH_TILE = 512            # measured HBM-roofline knee (~85%) on v6e


def _round_up(n, m):
    return ((n + m - 1) // m) * m


def _cdiv(a, b):
    return (a + b - 1) // b


def _vmem_capacity_bytes():
    """Physical per-core VMEM; conservative 64 MiB (v7x per-TC) if the query fails."""
    try:
        return int(pltpu.get_tpu_info().vmem_capacity_bytes)
    except Exception:
        return 64 * 1024 * 1024


# ------------------------------------------------------------------ kernels
def _fused_kernel(x_ref, w1_ref, b1_ref, w2_ref, o_ref):
    """Whole hidden dim resident: o = tanh(relu(x @ W1 + b1) @ W2)."""
    x_bf = x_ref[...].astype(jnp.bfloat16)           # no-op if x is already bf16
    h = jnp.dot(x_bf, w1_ref[...], preferred_element_type=jnp.float32)
    h = jnp.maximum(h + b1_ref[...], 0.0)             # f32 elementwise (v5e-safe)
    y = jnp.dot(h.astype(jnp.bfloat16), w2_ref[...],
                preferred_element_type=jnp.float32)
    o_ref[...] = jnp.tanh(y).astype(o_ref.dtype)


def _hidden_tiled_kernel(x_ref, w1_ref, b1_ref, w2_ref, o_ref, acc_ref):
    """Hidden dim tiled on grid axis 1 ("arbitrary"); f32 accumulator in VMEM."""
    k = pl.program_id(1)

    @pl.when(k == 0)
    def _():
        acc_ref[...] = jnp.zeros_like(acc_ref)

    x_bf = x_ref[...].astype(jnp.bfloat16)
    h = jnp.dot(x_bf, w1_ref[...], preferred_element_type=jnp.float32)
    h = jnp.maximum(h + b1_ref[...], 0.0)
    acc_ref[...] += jnp.dot(h.astype(jnp.bfloat16), w2_ref[...],
                            preferred_element_type=jnp.float32)

    @pl.when(k == pl.num_programs(1) - 1)
    def _():
        o_ref[...] = jnp.tanh(acc_ref[...]).astype(o_ref.dtype)


# ------------------------------------------------------------------ parameter prep
def prepare_params(w1, b1, w2):
    """One-time parameter prep (do NOT call per forward pass).

    w1: (H, I) f32, b1: (H,) f32, w2: (O, H) f32   (PyTorch nn.Linear layout)
    Returns (w1_t, b1_p, w2_t, out_dim):
      w1_t: (I, Hp)  bf16, zero-padded columns
      b1_p: (1, Hp)  f32,  zero-padded
      w2_t: (Hp, Op) bf16, zero-padded rows/cols
    Zero padding is exact: padded hidden units are relu(0 + 0) = 0 feeding zero rows
    of W2, and padded output columns are tanh(0) = 0, sliced off by the wrapper.
    """
    H, I = w1.shape
    O, _ = w2.shape
    Hp = _round_up(H, _LANE)
    Op = _round_up(O, _LANE)

    w1_t = jnp.zeros((I, Hp), jnp.bfloat16).at[:, :H].set(w1.T.astype(jnp.bfloat16))
    b1_p = jnp.zeros((1, Hp), jnp.float32).at[:, :H].set(b1.astype(jnp.float32))
    w2_t = jnp.zeros((Hp, Op), jnp.bfloat16).at[:H, :O].set(w2.T.astype(jnp.bfloat16))
    return w1_t, b1_p, w2_t, O


def _choose_batch_tile(B, bytes_per_row, fixed_bytes, budget):
    # Cap so that (a) tile <= 512 rows (roofline knee), (b) the grid has >= 2 steps
    # whenever B allows it (v7x dual-TC + pipelining), (c) everything fits the budget.
    if B > _SUBLANE:
        cap = min(_MAX_BATCH_TILE, _round_up(_cdiv(B, 2), _SUBLANE))
    else:
        cap = _round_up(max(B, 1), _SUBLANE)
    avail = max(budget - fixed_bytes, 0)
    tb_budget = avail // max(bytes_per_row, 1)
    tb = min(cap, (tb_budget // _SUBLANE) * _SUBLANE)
    return max(_SUBLANE, tb)


# ------------------------------------------------------------------ wrapper
def perceptron_tanh(x, w1_t, b1_p, w2_t, out_dim, *,
                    block_b=None, hidden_tile=None, out_dtype=None,
                    return_padded=False):
    """x: (B, I) f32 or bf16; params from prepare_params().

    Returns (B, out_dim) in out_dtype (defaults to x.dtype).  With return_padded=True
    the lane-padded (B, Op) slab is returned instead, avoiding the extra HBM pass the
    slice would cost when the consumer can fuse/ignore the zero padding.
    """
    B, I = x.shape
    Hp = w1_t.shape[1]
    Op = w2_t.shape[1]
    out_dtype = x.dtype if out_dtype is None else out_dtype

    x_isz = jnp.dtype(x.dtype).itemsize
    o_isz = jnp.dtype(out_dtype).itemsize

    capacity = _vmem_capacity_bytes()
    budget = int(capacity * 0.7)            # headroom for compiler temporaries
    vmem_reserve = 2 * 1024 * 1024

    # Single-buffered resident-weight footprint (bias (1,Hp) pads to 8 sublanes in VMEM).
    weight_bytes = I * Hp * 2 + Hp * Op * 2 + _SUBLANE * Hp * 4

    cost = pl.CostEstimate(
        flops=2 * B * (I * Hp + Hp * Op),
        transcendentals=B * Op,                                    # tanh
        bytes_accessed=(B * I * x_isz + I * Hp * 2 + Hp * 4 + Hp * Op * 2
                        + B * Op * o_isz),
    )

    if block_b is not None:
        assert block_b % _SUBLANE == 0 or block_b >= B, block_b

    use_hidden_tiling = hidden_tile is not None or weight_bytes > budget // 2

    if not use_hidden_tiling:
        # ------------- fused path: both weight matrices VMEM-resident ---------------
        # Per-row VMEM: double-buffered x/out tiles + f32/bf16 intermediates (h, y).
        bytes_per_row = 2 * (I * x_isz + Op * o_isz) + Hp * 6 + Op * 4
        tb = (_choose_batch_tile(B, bytes_per_row, weight_bytes, budget)
              if block_b is None else block_b)
        grid_b = _cdiv(B, tb)
        vmem_limit = int(min(capacity - vmem_reserve,
                             max(32 * 1024 * 1024,
                                 weight_bytes + tb * bytes_per_row + 8 * 1024 * 1024)))

        def call(single_buffer_weights):
            # Grid-invariant operands: constant index_map; Buffered(1) halves their VMEM
            # footprint (no second DMA is ever issued for them anyway).
            wkw = {"pipeline_mode": pl.Buffered(1)} if single_buffer_weights else {}
            return pl.pallas_call(
                _fused_kernel,
                out_shape=jax.ShapeDtypeStruct((B, Op), out_dtype),
                grid_spec=pltpu.PrefetchScalarGridSpec(
                    num_scalar_prefetch=0,
                    grid=(grid_b,),
                    in_specs=[
                        pl.BlockSpec((tb, I), lambda i: (i, 0)),          # x (streamed)
                        pl.BlockSpec((I, Hp), lambda i: (0, 0), **wkw),   # W1 (resident)
                        pl.BlockSpec((1, Hp), lambda i: (0, 0), **wkw),   # b1 (resident)
                        pl.BlockSpec((Hp, Op), lambda i: (0, 0), **wkw),  # W2 (resident)
                    ],
                    out_specs=pl.BlockSpec((tb, Op), lambda i: (i, 0)),
                ),
                compiler_params=pltpu.CompilerParams(
                    dimension_semantics=("parallel",),        # megacore / v7x dual-TC
                    vmem_limit_bytes=vmem_limit,
                ),
                cost_estimate=cost,
            )(x, w1_t, b1_p, w2_t)

        try:
            out_padded = call(True)        # single-buffer the grid-invariant weights
        except Exception:
            out_padded = call(False)       # jax without Buffered(1): default buffering
    else:
        # ------------- hidden-tiled fallback: weights exceed VMEM budget ------------
        if hidden_tile is None:
            per_th = 2 * (I * 2 + Op * 2 + _SUBLANE * 4)   # double-buffered weight slabs
            th = (max(budget // 2, per_th * _LANE) // per_th // _LANE) * _LANE
            th = max(_LANE, min(th, Hp))
            while Hp % th:
                th -= _LANE
        else:
            th = hidden_tile
        assert Hp % th == 0 and th % _LANE == 0, (Hp, th)

        bytes_per_row = 2 * (I * x_isz + Op * o_isz) + Op * 4 + th * 6
        fixed = 2 * th * (I * 2 + Op * 2 + _SUBLANE * 4)
        tb = (_choose_batch_tile(B, bytes_per_row, fixed, budget)
              if block_b is None else block_b)
        grid = (_cdiv(B, tb), Hp // th)
        vmem_limit = int(min(capacity - vmem_reserve,
                             max(32 * 1024 * 1024,
                                 fixed + tb * bytes_per_row + 8 * 1024 * 1024)))

        out_padded = pl.pallas_call(
            _hidden_tiled_kernel,
            out_shape=jax.ShapeDtypeStruct((B, Op), out_dtype),
            grid_spec=pltpu.PrefetchScalarGridSpec(
                num_scalar_prefetch=0,
                grid=grid,
                in_specs=[
                    pl.BlockSpec((tb, I), lambda i, k: (i, 0)),    # x (resident over k)
                    pl.BlockSpec((I, th), lambda i, k: (0, k)),    # W1 hidden slab
                    pl.BlockSpec((1, th), lambda i, k: (0, k)),    # b1 hidden slab
                    pl.BlockSpec((th, Op), lambda i, k: (k, 0)),   # W2 hidden slab
                ],
                out_specs=pl.BlockSpec((tb, Op), lambda i, k: (i, 0)),
                scratch_shapes=[pltpu.VMEM((tb, Op), jnp.float32)],
            ),
            compiler_params=pltpu.CompilerParams(
                dimension_semantics=("parallel", "arbitrary"),
                vmem_limit_bytes=vmem_limit,
            ),
            cost_estimate=cost,
        )(x, w1_t, b1_p, w2_t)
        # TODO(synk): also tile Op on a third axis for output dims too large for VMEM.

    if return_padded:
        return out_padded
    # Drop the zero-padded output lanes (tanh(0)=0 columns).
    return out_padded[:, :out_dim]


# ------------------------------------------------------------------ reference + demo
def _reference(x, w1, b1, w2):
    h = jnp.maximum(x @ w1.T + b1, 0.0)
    return jnp.tanh(h @ w2.T)


if __name__ == "__main__":
    key = jax.random.PRNGKey(0)
    kx, kw1, kb1, kw2, kx2, kw3, kb3, kw4 = jax.random.split(key, 8)

    # ---- Test 1: fused path (weights VMEM-resident), f32 input -------------------
    batch, input_dim, hidden_dim, output_dim = 64, 32, 64, 16
    x = jax.random.normal(kx, (batch, input_dim), dtype=jnp.float32)
    bound1 = 1.0 / math.sqrt(input_dim)
    w1 = jax.random.uniform(kw1, (hidden_dim, input_dim),
                            minval=-bound1, maxval=bound1, dtype=jnp.float32)
    b1 = jax.random.uniform(kb1, (hidden_dim,),
                            minval=-bound1, maxval=bound1, dtype=jnp.float32)
    bound2 = 1.0 / math.sqrt(hidden_dim)
    w2 = jax.random.uniform(kw2, (output_dim, hidden_dim),
                            minval=-bound2, maxval=bound2, dtype=jnp.float32)

    params = prepare_params(w1, b1, w2)      # one-time transpose / pad / bf16 cast
    out = jax.block_until_ready(perceptron_tanh(x, *params))
    ref = _reference(x, w1, b1, w2)
    assert out.shape == (batch, output_dim)
    assert jnp.allclose(out, ref, atol=2e-2, rtol=2e-2), \
        float(jnp.max(jnp.abs(out - ref)))

    # ---- Test 2: hidden-tiled fallback, bf16 input, ragged batch grid ------------
    batch2, input_dim2, hidden_dim2, output_dim2 = 40, 32, 256, 16
    x2 = jax.random.normal(kx2, (batch2, input_dim2),
                           dtype=jnp.float32).astype(jnp.bfloat16)
    bound3 = 1.0 / math.sqrt(input_dim2)
    w3 = jax.random.uniform(kw3, (hidden_dim2, input_dim2),
                            minval=-bound3, maxval=bound3, dtype=jnp.float32)
    b3 = jax.random.uniform(kb3, (hidden_dim2,),
                            minval=-bound3, maxval=bound3, dtype=jnp.float32)
    bound4 = 1.0 / math.sqrt(hidden_dim2)
    w4 = jax.random.uniform(kw4, (output_dim2, hidden_dim2),
                            minval=-bound4, maxval=bound4, dtype=jnp.float32)

    params2 = prepare_params(w3, b3, w4)
    out2 = jax.block_until_ready(
        perceptron_tanh(x2, *params2, hidden_tile=128, out_dtype=jnp.float32))
    ref2 = _reference(x2.astype(jnp.float32), w3, b3, w4)
    assert out2.shape == (batch2, output_dim2)
    assert jnp.allclose(out2, ref2, atol=4e-2, rtol=4e-2), \
        float(jnp.max(jnp.abs(out2 - ref2)))

    print("KERNEL_OK")
</pallas_src>

<mosaic_0001>
module attributes {stable_mosaic.version = 11 : i64} {
  func.func @_fused_kernel(%arg0: i32, %arg1: memref<32x32xf32, #tpu.memory_space<vmem>>, %arg2: memref<32x128xbf16, #tpu.memory_space<vmem>>, %arg3: memref<1x128xf32, #tpu.memory_space<vmem>>, %arg4: memref<128x128xbf16, #tpu.memory_space<vmem>>, %arg5: memref<32x128xf32, #tpu.memory_space<vmem>>) attributes {dimension_semantics = [#tpu.dimension_semantics<parallel>], iteration_bounds = array<i64: 2>, scalar_prefetch = 0 : i64, scratch_operands = 0 : i64, tpu.core_type = #tpu.core_type<tc>, window_params = [{transform_indices = @transform_0, window_bounds = array<i64: 32, 32>}, {pipeline_mode = #tpu.pipeline_mode<synchronous>, transform_indices = @transform_1, window_bounds = array<i64: 32, 128>}, {pipeline_mode = #tpu.pipeline_mode<synchronous>, transform_indices = @transform_2, window_bounds = array<i64: 1, 128>}, {pipeline_mode = #tpu.pipeline_mode<synchronous>, transform_indices = @transform_3, window_bounds = array<i64: 128, 128>}, {transform_indices = @transform_4, window_bounds = array<i64: 32, 128>}]} {
    %c0 = arith.constant 0 : index
    %c0_0 = arith.constant 0 : index
    %0 = vector.load %arg1[%c0, %c0_0] : memref<32x32xf32, #tpu.memory_space<vmem>>, vector<32x32xf32>
    %1 = arith.truncf %0 : vector<32x32xf32> to vector<32x32xbf16>
    %c0_1 = arith.constant 0 : index
    %c0_2 = arith.constant 0 : index
    %2 = vector.load %arg2[%c0_1, %c0_2] : memref<32x128xbf16, #tpu.memory_space<vmem>>, vector<32x128xbf16>
    %cst = arith.constant dense<0.000000e+00> : vector<32x128xf32>
    %3 = tpu.matmul %1, %2, %cst {dimension_numbers = #tpu.dot_dimension_numbers<[1], [0], [0], [1], [0, 0, 1, 1], [], []>} : vector<32x32xbf16>, vector<32x128xbf16>, vector<32x128xf32> -> vector<32x128xf32>
    %c0_3 = arith.constant 0 : index
    %c0_4 = arith.constant 0 : index
    %4 = vector.load %arg3[%c0_3, %c0_4] : memref<1x128xf32, #tpu.memory_space<vmem>>, vector<1x128xf32>
    %5 = vector.broadcast %4 : vector<1x128xf32> to vector<32x128xf32>
    %6 = arith.addf %3, %5 : vector<32x128xf32>
    %cst_5 = arith.constant 0.000000e+00 : f32
    %7 = vector.broadcast %cst_5 : f32 to vector<32x128xf32>
    %8 = arith.maximumf %6, %7 : vector<32x128xf32>
    %9 = arith.truncf %8 : vector<32x128xf32> to vector<32x128xbf16>
    %c0_6 = arith.constant 0 : index
    %c0_7 = arith.constant 0 : index
    %10 = vector.load %arg4[%c0_6, %c0_7] : memref<128x128xbf16, #tpu.memory_space<vmem>>, vector<128x128xbf16>
    %cst_8 = arith.constant dense<0.000000e+00> : vector<32x128xf32>
    %11 = tpu.matmul %9, %10, %cst_8 {dimension_numbers = #tpu.dot_dimension_numbers<[1], [0], [0], [1], [0, 0, 1, 1], [], []>} : vector<32x128xbf16>, vector<128x128xbf16>, vector<32x128xf32> -> vector<32x128xf32>
    %12 = math.tanh %11 : vector<32x128xf32>
    %c0_9 = arith.constant 0 : index
    %c0_10 = arith.constant 0 : index
    %13 = vector.load %arg5[%c0_9, %c0_10] : memref<32x128xf32, #tpu.memory_space<vmem>>, vector<32x128xf32>
    tpu.vector_store %arg5[%c0_9, %c0_10], %12 {strides = array<i32>} : memref<32x128xf32, #tpu.memory_space<vmem>>, vector<32x128xf32>,
    return
  }
  func.func @transform_0(%arg0: i32) -> (i32, i32) {
    %c0_i32 = arith.constant 0 : i32
    %c0_i32_0 = arith.constant 0 : i32
    return %arg0, %c0_i32 : i32, i32
  }
  func.func @transform_1(%arg0: i32) -> (i32, i32) {
    %c0_i32 = arith.constant 0 : i32
    %c0_i32_0 = arith.constant 0 : i32
    %c0_i32_1 = arith.constant 0 : i32
    return %c0_i32, %c0_i32_0 : i32, i32
  }
  func.func @transform_2(%arg0: i32) -> (i32, i32) {
    %c0_i32 = arith.constant 0 : i32
    %c0_i32_0 = arith.constant 0 : i32
    %c0_i32_1 = arith.constant 0 : i32
    return %c0_i32, %c0_i32_0 : i32, i32
  }
  func.func @transform_3(%arg0: i32) -> (i32, i32) {
    %c0_i32 = arith.constant 0 : i32
    %c0_i32_0 = arith.constant 0 : i32
    %c0_i32_1 = arith.constant 0 : i32
    return %c0_i32, %c0_i32_0 : i32, i32
  }
  func.func @transform_4(%arg0: i32) -> (i32, i32) {
    %c0_i32 = arith.constant 0 : i32
    %c0_i32_0 = arith.constant 0 : i32
    return %arg0, %c0_i32 : i32, i32
  }
}

module attributes {stable_mosaic.version = 11 : i64} {
  func.func @_fused_kernel(%arg0: i32, %arg1: memref<32x32xf32, #tpu.memory_space<vmem>>, %arg2: memref<32x128xbf16, #tpu.memory_space<vmem>>, %arg3: memref<1x128xf32, #tpu.memory_space<vmem>>, %arg4: memref<128x128xbf16, #tpu.memory_space<vmem>>, %arg5: memref<32x128xf32, #tpu.memory_space<vmem>>) attributes {dimension_semantics = [#tpu.dimension_semantics<parallel>], iteration_bounds = array<i64: 2>, scalar_prefetch = 0 : i64, scratch_operands = 0 : i64, tpu.core_type = #tpu.core_type<tc>, window_params = [{transform_indices = @transform_0, window_bounds = array<i64: 32, 32>}, {pipeline_mode = #tpu.pipeline_mode<synchronous>, transform_indices = @transform_1, window_bounds = array<i64: 32, 128>}, {pipeline_mode = #tpu.pipeline_mode<synchronous>, transform_indices = @transform_2, window_bounds = array<i64: 1, 128>}, {pipeline_mode = #tpu.pipeline_mode<synchronous>, transform_indices = @transform_3, window_bounds = array<i64: 128, 128>}, {transform_indices = @transform_4, window_bounds = array<i64: 32, 128>}]} {
    %c0 = arith.constant 0 : index
    %c0_0 = arith.constant 0 : index
    %0 = vector.load %arg1[%c0, %c0_0] : memref<32x32xf32, #tpu.memory_space<vmem>>, vector<32x32xf32>
    %1 = arith.truncf %0 : vector<32x32xf32> to vector<32x32xbf16>
    %c0_1 = arith.constant 0 : index
    %c0_2 = arith.constant 0 : index
    %2 = vector.load %arg2[%c0_1, %c0_2] : memref<32x128xbf16, #tpu.memory_space<vmem>>, vector<32x128xbf16>
    %cst = arith.constant dense<0.000000e+00> : vector<32x128xf32>
    %3 = tpu.matmul %1, %2, %cst {dimension_numbers = #tpu.dot_dimension_numbers<[1], [0], [0], [1], [0, 0, 1, 1], [], []>} : vector<32x32xbf16>, vector<32x128xbf16>, vector<32x128xf32> -> vector<32x128xf32>
    %c0_3 = arith.constant 0 : index
    %c0_4 = arith.constant 0 : index
    %4 = vector.load %arg3[%c0_3, %c0_4] : memref<1x128xf32, #tpu.memory_space<vmem>>, vector<1x128xf32>
    %5 = vector.broadcast %4 : vector<1x128xf32> to vector<32x128xf32>
    %6 = arith.addf %3, %5 : vector<32x128xf32>
    %cst_5 = arith.constant 0.000000e+00 : f32
    %7 = vector.broadcast %cst_5 : f32 to vector<32x128xf32>
    %8 = arith.maximumf %6, %7 : vector<32x128xf32>
    %9 = arith.truncf %8 : vector<32x128xf32> to vector<32x128xbf16>
    %c0_6 = arith.constant 0 : index
    %c0_7 = arith.constant 0 : index
    %10 = vector.load %arg4[%c0_6, %c0_7] : memref<128x128xbf16, #tpu.memory_space<vmem>>, vector<128x128xbf16>
    %cst_8 = arith.constant dense<0.000000e+00> : vector<32x128xf32>
    %11 = tpu.matmul %9, %10, %cst_8 {dimension_numbers = #tpu.dot_dimension_numbers<[1], [0], [0], [1], [0, 0, 1, 1], [], []>} : vector<32x128xbf16>, vector<128x128xbf16>, vector<32x128xf32> -> vector<32x128xf32>
    %12 = math.tanh %11 : vector<32x128xf32>
    %c0_9 = arith.constant 0 : index
    %c0_10 = arith.constant 0 : index
    %13 = vector.load %arg5[%c0_9, %c0_10] : memref<32x128xf32, #tpu.memory_space<vmem>>, vector<32x128xf32>
    tpu.vector_store %arg5[%c0_9, %c0_10], %12 {strides = array<i32>} : memref<32x128xf32, #tpu.memory_space<vmem>>, vector<32x128xf32>,
    return
  }
  func.func @transform_0(%arg0: i32) -> (i32, i32) {
    %c0_i32 = arith.constant 0 : i32
    %c0_i32_0 = arith.constant 0 : i32
    return %arg0, %c0_i32 : i32, i32
  }
  func.func @transform_1(%arg0: i32) -> (i32, i32) {
    %c0_i32 = arith.constant 0 : i32
    %c0_i32_0 = arith.constant 0 : i32
    %c0_i32_1 = arith.constant 0 : i32
    return %c0_i32, %c0_i32_0 : i32, i32
  }
  func.func @transform_2(%arg0: i32) -> (i32, i32) {
    %c0_i32 = arith.constant 0 : i32
    %c0_i32_0 = arith.constant 0 : i32
    %c0_i32_1 = arith.constant 0 : i32
    return %c0_i32, %c0_i32_0 : i32, i32
  }
  func.func @transform_3(%arg0: i32) -> (i32, i32) {
    %c0_i32 = arith.constant 0 : i32
    %c0_i32_0 = arith.constant 0 : i32
    %c0_i32_1 = arith.constant 0 : i32
    return %c0_i32, %c0_i32_0 : i32, i32
  }
  func.func @transform_4(%arg0: i32) -> (i32, i32) {
    %c0_i32 = arith.constant 0 : i32
    %c0_i32_0 = arith.constant 0 : i32
    return %arg0, %c0_i32 : i32, i32
  }
}

</mosaic_0001>

<bundles_post_ra>
// kernel: tpu_custom_call.1
= control target key start
LH: loop header
LB: loop body
LE: loop exit
PB: predicated region body
PF: predicated region fallthrough
CT: control target
= control target key end

     0   :  { %9 = vsyncpa [#allocation3], 0  ;;  %s758_s0 = inlined_call_operand.vmem [shape: f32[64,32], index: 0, kind: input, shape index: {}]   ;;  %s759_s1 = inlined_call_operand.vmem [shape: bf16[32,128], index: 1, kind: input, shape index: {}]   ;;  %s760_s2 = inlined_call_operand.vmem [shape: f32[1,128], index: 2, kind: input, shape index: {}]   ;;  %s761_s3 = inlined_call_operand.vmem [shape: bf16[128,128], index: 3, kind: input, shape index: {}]   ;;  %s762_s4 = inlined_call_operand.hbm [shape: f32[64,128], index: 4, kind: output, shape index: {}]  }
   0x1   :  { %11 = vsyncpa [#allocation3 + $0x1], 0  ;;  %s641_s15 = smov 0   ;;  %s643_s16 = smov 0  }
   0x2   :  { %s645_s17 = smov 0   ;;  %s647_s18 = smov 0  }
   0x3 LB: > { %s662_s19 = sadd.s32 4294967295, %s612_s18   ;;  %s427_s20 = sadd.s32 4294967294, %s612_s18   ;;  %s612_s18 = sphi %s647_s18, %s768_s18   ;;  %s608_s17 = sphi %s645_s17, %s767_s17   ;;  %s604_s16 = sphi %s643_s16, %s766_s16   ;;  %s600_s15 = sphi %s641_s15, %s765_s15  }
   0x4   : > { %s666_s21 = sadd.s32 1, %s612_s18   ;;  %s113_s22 = sadd.s32 1, %s608_s17 }
   0x5   : > { %s110_s23 = ssub.s32 %s612_s18, %s666_s21  ;;  %p123_p0 = scmp.ne.s32.totalorder %s608_s17, %s604_s16 }
   0x6   : > { %p111_p1 = scmp.eq.s32.totalorder %s110_s23, 0  ;;  %p124_p2 = scmp.eq.s32.totalorder %s662_s19, 1 }
   0x7   : > { %p129_p3 = scmp.ne.s32.totalorder %s604_s16, %s600_s15  ;;  %p130_p4 = scmp.eq.s32.totalorder %s427_s20, 1 }
   0x8   : > { %s677_s24 = scalar_select %p111_p1, %s608_s17, %s113_s22  }
   0x9   : > { %p679_p5 = por %p124_p2, %p123_p0  ;;  %p683_p6 = por %p130_p4, %p129_p3 }
   0xa   : > { %p430_p7 = scmp.ge.s32.totalorder %s612_s18, 1  ;;  %p166_p8 = scmp.lt.s32.totalorder %s612_s18, 3 }
   0xc   : > { %p167_p9 = pnand %p430_p7, %p166_p8 }
   0xd   : > { %s432_s29 = sshll.u32 (!%p167_p9), %s662_s19, 2  ;;  %s189_s11 = sand.u32 (!%p167_p9), 1, %s604_s16  }
   0xe   : > { %170 = sbr.rel (%p167_p9) target bundleno = 334 (0x14e), region = 36  ;;  %p193_p10 = scmp.lt.s32.totalorder (!%p167_p9), %s432_s29, 7 }
   0xf   : > { %s431_s12 = sshll.u32 (!%p167_p9), %s189_s11, 5  ;;  %s491_s14 = sshll.u32 (!%p167_p9), %s662_s19, 5 }
  0x10   : > { %s361_s23 = scalar_lea.hbm (!%p167_p9), %s762_s4, %s491_s14  ;;  %s570_s7 = scalar_lea.hbm (!%p167_p9), %s762_s4, 64 }
  0x11   : > { %s364_s28 = sshll.u32 (!%p167_p9), %s361_s23, 4  ;;  %s365_s28 = int_to_ptr.hbm [resolvable:$true] %s364_s28 }
  0x12   : > { %s564_s30 = sshra.s32 (!%p167_p9), %s365_s28, 4  ;;  %s565_s30 = int_to_ptr.hbm [resolvable:$true] %s564_s30 }
  0x13   : > { %v482_v0 = vld [vmem:[%s759_s1 + $0x8] sm:$0xff]  ;;  %v490_v1 = vld [vmem:[%s761_s3 + $0x38] sm:$0xff]  ;;  %v481_v2 = vld [vmem:[%s759_s1] sm:$0xff]  ;;  %s770_s29 = smov (!%p193_p10, %s432_s29), 7  ;;  %vm226_vm0 = vcmask 261120   ;;  %s566_s5 = scalar_lea.hbm %s565_s30, 32 }
  0x14   : > { %239 = vmatpush.bf16.msra.mxu0 %v482_v0  ;;  %322 = vmatpush.bf16.msra.mxu1 %v490_v1  ;;  %v489_v3 = vld [vmem:[%s761_s3 + $0x30] sm:$0xff]  ;;  %s433_s10 = sshll.u32 %s770_s29, 3  ;;  %v488_v4 = vld [vmem:[%s761_s3 + $0x28] sm:$0xff]  ;;  %v487_v8 = vld [vmem:[%s761_s3 + $0x20] sm:$0xff]  ;;  %s350_s29 = scalar_lea.sflag [#allocation3], %s189_s11 }
  0x15   : > { %492 = vmatpush.bf16.msra.mxu2 %v490_v1  ;;  %s196_s13 = scalar_lea.vmem %s758_s0, %s433_s10  ;;  %v486_v12 = vld [vmem:[%s761_s3 + $0x18] sm:$0xff]  ;;  %v485_v13 = vld [vmem:[%s761_s3 + $0x10] sm:$0xff]  ;;  %v484_v14 = vld [vmem:[%s761_s3 + $0x8] sm:$0xff]  ;;  %p567_p11 = scmp.ne.s32.totalorder %s565_s30, %s566_s5 }
  0x16   : > { %v200_v5 = vld [vmem:[%s196_s13] sm:$0xff]  ;;  %v201_v6 = vld [vmem:[%s196_s13 + $0x8] sm:$0xff]  ;;  %v202_v9 = vld [vmem:[%s196_s13 + $0x10] sm:$0xff]  ;;  %p571_p0 = scmp.lt.s32.totalorder %s565_s30, %s762_s4  ;;  %p572_p1 = scmp.lt.s32.totalorder %s570_s7, %s566_s5 }
  0x17   : > { %v204_v7 = vpack.c.bf16 %v201_v6, %v200_v5  ;;  %v203_v10 = vld [vmem:[%s196_s13 + $0x18] sm:$0xff]  ;;  %v483_v15 = vld [vmem:[%s761_s3] sm:$0xff]  ;;  %s191_s13 = scalar_lea.vmem [#allocation2], %s431_s12  ;;  %p568_p12 = pnand %p567_p11, %p679_p5 }
  0x18   : > { %240 = vmatpush.bf16.msra.mxu0 %v481_v2  ;;  %323 = vmatpush.bf16.msra.mxu1 %v489_v3  ;;  %v205_v11 = vpack.c.bf16 %v203_v10, %v202_v9  ;;  %v541_v17 = vld [vmem:[%s760_s2] ss:$0 sm:$0xff]  ;;  %s362_s27 = sshll.u32 %s191_s13, 4  ;;  %p573_p2 = por %p572_p1, %p571_p0  ;;  %s363_s27 = int_to_ptr.vmem [resolvable:$true] %s362_s27 }
  0x19   : > { %493 = vmatpush.bf16.msra.mxu2 %v489_v3  ;;  %p569_p13 = pneg %p568_p12 }
  0x1b   : > { %442 = vmatmul.msk.bf16.vlgmr.msra.gmra.mxu0 %vm226_vm0, %v204_v7  ;;  %p574_p3 = pnand %p573_p2, %p569_p13 }
  0x1c   : > { %324 = vmatpush.bf16.msra.mxu1 %v488_v4 }
  0x1d   : > { %494 = vmatpush.bf16.msra.mxu2 %v488_v4 }
  0x20   : > { %325 = vmatpush.bf16.msra.mxu1 %v487_v8 }
  0x21   : > { %495 = vmatpush.bf16.msra.mxu2 %v487_v8 }
  0x24   : > { %326 = vmatpush.bf16.msra.mxu1 %v486_v12 }
  0x25   : > { %496 = vmatpush.bf16.msra.mxu2 %v486_v12 }
  0x28   : > { %327 = vmatpush.bf16.msra.mxu1 %v485_v13 }
  0x29   : > { %497 = vmatpush.bf16.msra.mxu2 %v485_v13 }
  0x2b   : > { %443 = vmatmul.msk.bf16.gmra.mxu0 %vm226_vm0, %v205_v11 }
  0x2c   : > { %328 = vmatpush.bf16.msra.mxu1 %v484_v14 }
  0x2d   : > { %498 = vmatpush.bf16.msra.mxu2 %v484_v14 }
  0x30   : > { %329 = vmatpush.bf16.msra.mxu1 %v483_v15 }
  0x31   : > { %499 = vmatpush.bf16.msra.mxu2 %v483_v15 }
  0x98   : > { %v242_v16 = vpop.f32.mrf.mxu0 }
  0x99   : > { %v243_v18 = vadd.f32 %v541_v17, %v242_v16 }
  0x9b   : > { %v252_v21 = vmax.f32 %v243_v18, 0.0 }
  0xa0   : > { %v244_v19 = vpop.f32.mrf.mxu0 }
  0xa1   : > { %v245_v20 = vadd.f32 %v541_v17, %v244_v19 }
  0xa3   : > { %v253_v22 = vmax.f32 %v245_v20, 0.0 }
  0xa5   : > { %v256_v23 = vpack.c.bf16 %v253_v22, %v252_v21 }
  0xa7   : > { %330 = vmatmul.bf16.vlgmr.msra.gmra.mxu1 %v256_v23 }
  0xa8   : > { %v247_v24 = vpop.f32.mrf.mxu0 }
  0xa9   : > { %v248_v25 = vadd.f32 %v541_v17, %v247_v24 }
  0xab   : > { %v254_v28 = vmax.f32 %v248_v25, 0.0 }
  0xb0   : > { %v249_v26 = vpop.f32.mrf.mxu0 }
  0xb1   : > { %v250_v27 = vadd.f32 %v541_v17, %v249_v26 }
  0xb3   : > { %v255_v29 = vmax.f32 %v250_v27, 0.0 }
  0xb5   : > { %v257_v30 = vpack.c.bf16 %v255_v29, %v254_v28 }
  0xb7   : > { %335 = vmatmul.bf16.vlgmr.msra.gmra.mxu2 %v257_v30 }
 0x124   : > { %v331_v31 = vpop.f32.mrf.mxu1 }
 0x125   : > { %542 = vtanh.f32 %v331_v31 }
 0x12b   : > { %v543_v32 = vpop.eup %542 }
 0x12c   : > { %345 = vst [vmem:[%s191_s13] sm:$0xff] %v543_v32  ;;  %v333_v33 = vpop.f32.mrf.mxu1 }
 0x12d   : > { %544 = vtanh.f32 %v333_v33 }
 0x133   : > { %v545_v34 = vpop.eup %544 }
 0x134   : > { %346 = vst [vmem:[%s191_s13 + $0x8] sm:$0xff] %v545_v34 }
 0x13a   : > { %v336_v35 = vpop.f32.mrf.mxu2 }
 0x13b   : > { %546 = vtanh.f32 %v336_v35 }
 0x141   : > { %v547_v36 = vpop.eup %546 }
 0x142   : > { %347 = vst [vmem:[%s191_s13 + $0x10] sm:$0xff] %v547_v36  ;;  %v338_v37 = vpop.f32.mrf.mxu2 }
 0x143   : > { %548 = vtanh.f32 %v338_v37 }
 0x149   : > { %v549_v38 = vpop.eup %548 }
 0x14a   : > { %348 = vst [vmem:[%s191_s13 + $0x18] sm:$0xff] %v549_v38 }
 0x14b   : > { %577 = shalt.err (!%p574_p3)
}
 0x14c   : > { %s614_s10 = smov 128   ;;  %s615_s11 = smov 8  }
 0x14d   : > { %500 = dma.vmem_to_hbm [thread:$0]  (%p679_p5), %s363_s27, 512, %s365_s28, %s350_s29, %s614_s10, %s614_s10, %s615_s11  }
 0x14e PF: > { %p506_p4 = scmp.ge.s32.totalorder %s612_s18, 2  ;;  %s379_s12 = sand.u32 1, %s600_s15  }
 0x14f   : > { %s380_s13 = scalar_lea.sflag [#allocation3], %s379_s12 }
 0x150   : > { %p503_p7 = pnand %p506_p4, %p683_p6 }
 0x152   : > { %p504_p8 = pneg %p503_p7 }
 0x154   : > { %595 = dma.done.wait (%p504_p8), %s380_s13, 512  }
 0x155   : > { %597 = vsyncadd (%p504_p8), %s380_s13, 4294966784  ;;  %p14_p9 = scmp.ge.s32.totalorder %s666_s21, 4   ;;  %s765_s15 = smov %s604_s16 }
 0x156   : > { %s766_s16 = smov %s608_s17  ;;  %s767_s17 = smov %s677_s24 }
 0x157   : > { %s768_s18 = smov %s666_s21  ;;  %16 = sbr.rel (!%p14_p9) target bundleno = 3 (0x3), region = 71 }
 0x15c   :  { %386 = vsyncpa [#allocation3], 1 }
 0x15d   :  { %388 = vsyncpa [#allocation3 + $0x1], 1 }

// kernel: tpu_custom_call.1
= control target key start
LH: loop header
LB: loop body
LE: loop exit
PB: predicated region body
PF: predicated region fallthrough
CT: control target
= control target key end

     0   :  { %9 = vsyncpa [#allocation3], 0  ;;  %s758_s0 = inlined_call_operand.vmem [shape: f32[64,32], index: 0, kind: input, shape index: {}]   ;;  %s759_s1 = inlined_call_operand.vmem [shape: bf16[32,128], index: 1, kind: input, shape index: {}]   ;;  %s760_s2 = inlined_call_operand.vmem [shape: f32[1,128], index: 2, kind: input, shape index: {}]   ;;  %s761_s3 = inlined_call_operand.vmem [shape: bf16[128,128], index: 3, kind: input, shape index: {}]   ;;  %s762_s4 = inlined_call_operand.hbm [shape: f32[64,128], index: 4, kind: output, shape index: {}]  }
   0x1   :  { %11 = vsyncpa [#allocation3 + $0x1], 0  ;;  %s641_s15 = smov 0   ;;  %s643_s16 = smov 0  }
   0x2   :  { %s645_s17 = smov 0   ;;  %s647_s18 = smov 0  }
   0x3 LB: > { %s662_s19 = sadd.s32 4294967295, %s612_s18   ;;  %s427_s20 = sadd.s32 4294967294, %s612_s18   ;;  %s612_s18 = sphi %s647_s18, %s768_s18   ;;  %s608_s17 = sphi %s645_s17, %s767_s17   ;;  %s604_s16 = sphi %s643_s16, %s766_s16   ;;  %s600_s15 = sphi %s641_s15, %s765_s15  }
   0x4   : > { %s666_s21 = sadd.s32 1, %s612_s18   ;;  %s113_s22 = sadd.s32 1, %s608_s17 }
   0x5   : > { %s110_s23 = ssub.s32 %s612_s18, %s666_s21  ;;  %p123_p0 = scmp.ne.s32.totalorder %s608_s17, %s604_s16 }
   0x6   : > { %p111_p1 = scmp.eq.s32.totalorder %s110_s23, 0  ;;  %p124_p2 = scmp.eq.s32.totalorder %s662_s19, 1 }
   0x7   : > { %p129_p3 = scmp.ne.s32.totalorder %s604_s16, %s600_s15  ;;  %p130_p4 = scmp.eq.s32.totalorder %s427_s20, 1 }
   0x8   : > { %s677_s24 = scalar_select %p111_p1, %s608_s17, %s113_s22  }
   0x9   : > { %p679_p5 = por %p124_p2, %p123_p0  ;;  %p683_p6 = por %p130_p4, %p129_p3 }
   0xa   : > { %p430_p7 = scmp.ge.s32.totalorder %s612_s18, 1  ;;  %p166_p8 = scmp.lt.s32.totalorder %s612_s18, 3 }
   0xc   : > { %p167_p9 = pnand %p430_p7, %p166_p8 }
   0xd   : > { %s432_s29 = sshll.u32 (!%p167_p9), %s662_s19, 2  ;;  %s189_s11 = sand.u32 (!%p167_p9), 1, %s604_s16  }
   0xe   : > { %170 = sbr.rel (%p167_p9) target bundleno = 334 (0x14e), region = 36  ;;  %p193_p10 = scmp.lt.s32.totalorder (!%p167_p9), %s432_s29, 7 }
   0xf   : > { %s431_s12 = sshll.u32 (!%p167_p9), %s189_s11, 5  ;;  %s491_s14 = sshll.u32 (!%p167_p9), %s662_s19, 5 }
  0x10   : > { %s361_s23 = scalar_lea.hbm (!%p167_p9), %s762_s4, %s491_s14  ;;  %s570_s7 = scalar_lea.hbm (!%p167_p9), %s762_s4, 64 }
  0x11   : > { %s364_s28 = sshll.u32 (!%p167_p9), %s361_s23, 4  ;;  %s365_s28 = int_to_ptr.hbm [resolvable:$true] %s364_s28 }
  0x12   : > { %s564_s30 = sshra.s32 (!%p167_p9), %s365_s28, 4  ;;  %s565_s30 = int_to_ptr.hbm [resolvable:$true] %s564_s30 }
  0x13   : > { %v482_v0 = vld [vmem:[%s759_s1 + $0x8] sm:$0xff]  ;;  %v490_v1 = vld [vmem:[%s761_s3 + $0x38] sm:$0xff]  ;;  %v481_v2 = vld [vmem:[%s759_s1] sm:$0xff]  ;;  %s770_s29 = smov (!%p193_p10, %s432_s29), 7  ;;  %vm226_vm0 = vcmask 261120   ;;  %s566_s5 = scalar_lea.hbm %s565_s30, 32 }
  0x14   : > { %239 = vmatpush.bf16.msra.mxu0 %v482_v0  ;;  %322 = vmatpush.bf16.msra.mxu1 %v490_v1  ;;  %v489_v3 = vld [vmem:[%s761_s3 + $0x30] sm:$0xff]  ;;  %s433_s10 = sshll.u32 %s770_s29, 3  ;;  %v488_v4 = vld [vmem:[%s761_s3 + $0x28] sm:$0xff]  ;;  %v487_v8 = vld [vmem:[%s761_s3 + $0x20] sm:$0xff]  ;;  %s350_s29 = scalar_lea.sflag [#allocation3], %s189_s11 }
  0x15   : > { %492 = vmatpush.bf16.msra.mxu2 %v490_v1  ;;  %s196_s13 = scalar_lea.vmem %s758_s0, %s433_s10  ;;  %v486_v12 = vld [vmem:[%s761_s3 + $0x18] sm:$0xff]  ;;  %v485_v13 = vld [vmem:[%s761_s3 + $0x10] sm:$0xff]  ;;  %v484_v14 = vld [vmem:[%s761_s3 + $0x8] sm:$0xff]  ;;  %p567_p11 = scmp.ne.s32.totalorder %s565_s30, %s566_s5 }
  0x16   : > { %v200_v5 = vld [vmem:[%s196_s13] sm:$0xff]  ;;  %v201_v6 = vld [vmem:[%s196_s13 + $0x8] sm:$0xff]  ;;  %v202_v9 = vld [vmem:[%s196_s13 + $0x10] sm:$0xff]  ;;  %p571_p0 = scmp.lt.s32.totalorder %s565_s30, %s762_s4  ;;  %p572_p1 = scmp.lt.s32.totalorder %s570_s7, %s566_s5 }
  0x17   : > { %v204_v7 = vpack.c.bf16 %v201_v6, %v200_v5  ;;  %v203_v10 = vld [vmem:[%s196_s13 + $0x18] sm:$0xff]  ;;  %v483_v15 = vld [vmem:[%s761_s3] sm:$0xff]  ;;  %s191_s13 = scalar_lea.vmem [#allocation2], %s431_s12  ;;  %p568_p12 = pnand %p567_p11, %p679_p5 }
  0x18   : > { %240 = vmatpush.bf16.msra.mxu0 %v481_v2  ;;  %323 = vmatpush.bf16.msra.mxu1 %v489_v3  ;;  %v205_v11 = vpack.c.bf16 %v203_v10, %v202_v9  ;;  %v541_v17 = vld [vmem:[%s760_s2] ss:$0 sm:$0xff]  ;;  %s362_s27 = sshll.u32 %s191_s13, 4  ;;  %p573_p2 = por %p572_p1, %p571_p0  ;;  %s363_s27 = int_to_ptr.vmem [resolvable:$true] %s362_s27 }
  0x19   : > { %493 = vmatpush.bf16.msra.mxu2 %v489_v3  ;;  %p569_p13 = pneg %p568_p12 }
  0x1b   : > { %442 = vmatmul.msk.bf16.vlgmr.msra.gmra.mxu0 %vm226_vm0, %v204_v7  ;;  %p574_p3 = pnand %p573_p2, %p569_p13 }
  0x1c   : > { %324 = vmatpush.bf16.msra.mxu1 %v488_v4 }
  0x1d   : > { %494 = vmatpush.bf16.msra.mxu2 %v488_v4 }
  0x20   : > { %325 = vmatpush.bf16.msra.mxu1 %v487_v8 }
  0x21   : > { %495 = vmatpush.bf16.msra.mxu2 %v487_v8 }
  0x24   : > { %326 = vmatpush.bf16.msra.mxu1 %v486_v12 }
  0x25   : > { %496 = vmatpush.bf16.msra.mxu2 %v486_v12 }
  0x28   : > { %327 = vmatpush.bf16.msra.mxu1 %v485_v13 }
  0x29   : > { %497 = vmatpush.bf16.msra.mxu2 %v485_v13 }
  0x2b   : > { %443 = vmatmul.msk.bf16.gmra.mxu0 %vm226_vm0, %v205_v11 }
  0x2c   : > { %328 = vmatpush.bf16.msra.mxu1 %v484_v14 }
  0x2d   : > { %498 = vmatpush.bf16.msra.mxu2 %v484_v14 }
  0x30   : > { %329 = vmatpush.bf16.msra.mxu1 %v483_v15 }
  0x31   : > { %499 = vmatpush.bf16.msra.mxu2 %v483_v15 }
  0x98   : > { %v242_v16 = vpop.f32.mrf.mxu0 }
  0x99   : > { %v243_v18 = vadd.f32 %v541_v17, %v242_v16 }
  0x9b   : > { %v252_v21 = vmax.f32 %v243_v18, 0.0 }
  0xa0   : > { %v244_v19 = vpop.f32.mrf.mxu0 }
  0xa1   : > { %v245_v20 = vadd.f32 %v541_v17, %v244_v19 }
  0xa3   : > { %v253_v22 = vmax.f32 %v245_v20, 0.0 }
  0xa5   : > { %v256_v23 = vpack.c.bf16 %v253_v22, %v252_v21 }
  0xa7   : > { %330 = vmatmul.bf16.vlgmr.msra.gmra.mxu1 %v256_v23 }
  0xa8   : > { %v247_v24 = vpop.f32.mrf.mxu0 }
  0xa9   : > { %v248_v25 = vadd.f32 %v541_v17, %v247_v24 }
  0xab   : > { %v254_v28 = vmax.f32 %v248_v25, 0.0 }
  0xb0   : > { %v249_v26 = vpop.f32.mrf.mxu0 }
  0xb1   : > { %v250_v27 = vadd.f32 %v541_v17, %v249_v26 }
  0xb3   : > { %v255_v29 = vmax.f32 %v250_v27, 0.0 }
  0xb5   : > { %v257_v30 = vpack.c.bf16 %v255_v29, %v254_v28 }
  0xb7   : > { %335 = vmatmul.bf16.vlgmr.msra.gmra.mxu2 %v257_v30 }
 0x124   : > { %v331_v31 = vpop.f32.mrf.mxu1 }
 0x125   : > { %542 = vtanh.f32 %v331_v31 }
 0x12b   : > { %v543_v32 = vpop.eup %542 }
 0x12c   : > { %345 = vst [vmem:[%s191_s13] sm:$0xff] %v543_v32  ;;  %v333_v33 = vpop.f32.mrf.mxu1 }
 0x12d   : > { %544 = vtanh.f32 %v333_v33 }
 0x133   : > { %v545_v34 = vpop.eup %544 }
 0x134   : > { %346 = vst [vmem:[%s191_s13 + $0x8] sm:$0xff] %v545_v34 }
 0x13a   : > { %v336_v35 = vpop.f32.mrf.mxu2 }
 0x13b   : > { %546 = vtanh.f32 %v336_v35 }
 0x141   : > { %v547_v36 = vpop.eup %546 }
 0x142   : > { %347 = vst [vmem:[%s191_s13 + $0x10] sm:$0xff] %v547_v36  ;;  %v338_v37 = vpop.f32.mrf.mxu2 }
 0x143   : > { %548 = vtanh.f32 %v338_v37 }
 0x149   : > { %v549_v38 = vpop.eup %548 }
 0x14a   : > { %348 = vst [vmem:[%s191_s13 + $0x18] sm:$0xff] %v549_v38 }
 0x14b   : > { %577 = shalt.err (!%p574_p3)
}
 0x14c   : > { %s614_s10 = smov 128   ;;  %s615_s11 = smov 8  }
 0x14d   : > { %500 = dma.vmem_to_hbm [thread:$0]  (%p679_p5), %s363_s27, 512, %s365_s28, %s350_s29, %s614_s10, %s614_s10, %s615_s11  }
 0x14e PF: > { %p506_p4 = scmp.ge.s32.totalorder %s612_s18, 2  ;;  %s379_s12 = sand.u32 1, %s600_s15  }
 0x14f   : > { %s380_s13 = scalar_lea.sflag [#allocation3], %s379_s12 }
 0x150   : > { %p503_p7 = pnand %p506_p4, %p683_p6 }
 0x152   : > { %p504_p8 = pneg %p503_p7 }
 0x154   : > { %595 = dma.done.wait (%p504_p8), %s380_s13, 512  }
 0x155   : > { %597 = vsyncadd (%p504_p8), %s380_s13, 4294966784  ;;  %p14_p9 = scmp.ge.s32.totalorder %s666_s21, 4   ;;  %s765_s15 = smov %s604_s16 }
 0x156   : > { %s766_s16 = smov %s608_s17  ;;  %s767_s17 = smov %s677_s24 }
 0x157   : > { %s768_s18 = smov %s666_s21  ;;  %16 = sbr.rel (!%p14_p9) target bundleno = 3 (0x3), region = 71 }
 0x15c   :  { %386 = vsyncpa [#allocation3], 1 }
 0x15d   :  { %388 = vsyncpa [#allocation3 + $0x1], 1 }

</bundles_post_ra>
